<compile_context>
chip_gen: v6e
topology: v6e:2x2x1
jax: 0.10.0
libtpu: 0.0.40
codegen_flags: <defaults>
</compile_context>

<pallas_src>
import numpy as np
import jax
import jax.numpy as jnp
from jax.experimental import pallas as pl
from jax.experimental.pallas import tpu as pltpu


WORD_WIDTH = 26 * 5     # 130
HEAD_LANE = 128         # fused (actor | critic) head output width (lane-dense)
LANE = 128
SUB = 8


def _round_up(x, m):
    return (x + m - 1) // m * m


def _make_kernel(obs_pad, hid_pad, wpad, o_w0, o_w1, o_wh, n_words):
    def kernel(x_ref, pa_ref, pb_ref, out_ref):
        # x already carries a constant-1 lane at column obs_pad-1 (set in wrapper),
        # so layer-0 bias is folded into the matmul.
        x = x_ref[...].astype(jnp.bfloat16)                          # (TB, obs_pad)

        # f0: Linear -> ReLU -> Linear -> ReLU -> Linear -> ReLU
        # (biases live in the reserved const-lane rows of each weight block)
        w0 = pa_ref[o_w0:o_w0 + obs_pad, 0:hid_pad]                  # bf16
        h = jnp.maximum(
            jnp.dot(x, w0, preferred_element_type=jnp.float32), 0.0)

        w1 = pa_ref[o_w1:o_w1 + hid_pad, 0:hid_pad]
        h = jnp.maximum(
            jnp.dot(h.astype(jnp.bfloat16), w1,
                    preferred_element_type=jnp.float32), 0.0)

        w2 = pb_ref[...]                                             # (hid_pad, wpad)
        y = jnp.maximum(
            jnp.dot(h.astype(jnp.bfloat16), w2,
                    preferred_element_type=jnp.float32), 0.0)

        # fused head: cols [0:n_words] = actor logits (wa @ words folded),
        #             col  n_words     = critic value, remaining cols exactly 0
        wh = pa_ref[o_wh:o_wh + wpad, 0:HEAD_LANE]
        z = jnp.dot(y.astype(jnp.bfloat16), wh,
                    preferred_element_type=jnp.float32)              # (TB, 128) f32

        # masked, numerically-stable log-softmax over the first n_words columns
        col = jax.lax.broadcasted_iota(jnp.int32, z.shape, 1)
        is_logit = col < n_words
        zm = jnp.where(is_logit, z, -jnp.inf)
        m = jnp.max(zm, axis=-1, keepdims=True)
        e = jnp.exp(zm - m)                                          # -inf -> 0
        lse = m + jnp.log(jnp.sum(e, axis=-1, keepdims=True))

        # single select: log-softmax in logit cols, raw z (critic / zeros) elsewhere
        out_ref[...] = z - jnp.where(is_logit, lse, 0.0)

    return kernel


def prepare_params(params, words, param_dtype=jnp.bfloat16):
    """Fold actor head into word matrix, fuse critic, fold biases, pack (bf16)."""
    obs_size, hidden_size = params["w0"].shape
    n_words = words.shape[1]
    assert n_words + 1 <= HEAD_LANE, "word list too large for a single 128-lane head"

    # Lane paddings; the "+1" reserves a constant-1 lane that carries biases.
    obs_pad = _round_up(obs_size + 1, LANE)
    hid_pad = _round_up(hidden_size + 1, LANE)
    wpad = _round_up(WORD_WIDTH + 1, LANE)            # 256
    la = max(hid_pad, HEAD_LANE)                      # lane width of buffer A

    # algebraic fold: (y @ wa + ba) @ words == y @ (wa @ words) + (ba @ words)
    words_np = np.asarray(words, dtype=np.float32)
    w_act = np.asarray(params["wa"]) @ words_np                       # (130, n_words)
    b_act = np.asarray(params["ba"]) @ words_np                       # (1,   n_words)
    w_head = np.concatenate([w_act, np.asarray(params["wc"])], axis=1)
    b_head = np.concatenate([b_act, np.asarray(params["bc"])], axis=1)

    # ---- buffer A: 128-lane blocks (w0, w1, fused head), biases folded ----
    o_w0 = 0
    o_w1 = o_w0 + obs_pad
    o_wh = o_w1 + hid_pad
    rows_a = o_wh + wpad

    A = np.zeros((rows_a, la), dtype=np.float32)
    # layer 0
    A[o_w0:o_w0 + obs_size, 0:hidden_size] = np.asarray(params["w0"])
    A[o_w0 + obs_pad - 1, 0:hidden_size] = np.asarray(params["b0"])[0]
    A[o_w0 + obs_pad - 1, hid_pad - 1] = 1.0          # propagate const-1 lane
    # layer 1
    A[o_w1:o_w1 + hidden_size, 0:hidden_size] = np.asarray(params["w1"])
    A[o_w1 + hid_pad - 1, 0:hidden_size] = np.asarray(params["b1"])[0]
    A[o_w1 + hid_pad - 1, hid_pad - 1] = 1.0
    # fused head (actor | critic)
    A[o_wh:o_wh + WORD_WIDTH, 0:n_words + 1] = w_head
    A[o_wh + wpad - 1, 0:n_words + 1] = b_head[0]
    # critic column correctness relies on exact zero padding right of col n_words
    assert np.all(A[o_wh:o_wh + wpad, n_words + 1:HEAD_LANE] == 0.0)

    # ---- buffer B: 256-lane block (w2 only), bias folded ----
    Bm = np.zeros((hid_pad, wpad), dtype=np.float32)
    Bm[0:hidden_size, 0:WORD_WIDTH] = np.asarray(params["w2"])
    Bm[hid_pad - 1, 0:WORD_WIDTH] = np.asarray(params["b2"])[0]
    Bm[hid_pad - 1, wpad - 1] = 1.0                   # const-1 lane into the head

    meta = dict(obs_size=obs_size, obs_pad=obs_pad, hid_pad=hid_pad,
                wpad=wpad, la=la, n_words=n_words,
                o_w0=o_w0, o_w1=o_w1, o_wh=o_wh, rows_a=rows_a)
    return (jnp.asarray(A, dtype=param_dtype),
            jnp.asarray(Bm, dtype=param_dtype),
            meta)


def sumchars_forward(x, pa, pb, meta, tb_max=512):
    obs_size = meta["obs_size"]
    obs_pad, hid_pad, wpad = meta["obs_pad"], meta["hid_pad"], meta["wpad"]
    la, n_words, rows_a = meta["la"], meta["n_words"], meta["rows_a"]

    B = x.shape[0]
    tb = min(tb_max, _round_up(B, SUB))               # batch tile (rows)
    b_pad = _round_up(B, tb)

    # Lane-dense x with a constant-1 lane carrying the layer-0 bias; padded
    # batch rows are all-zero (finite through the kernel, sliced off below).
    x_pad = jnp.zeros((b_pad, obs_pad), jnp.float32)
    x_pad = x_pad.at[:B, :obs_size].set(x.astype(jnp.float32))
    x_pad = x_pad.at[:, obs_pad - 1].set(1.0)

    kernel = _make_kernel(obs_pad, hid_pad, wpad,
                          meta["o_w0"], meta["o_w1"], meta["o_wh"], n_words)

    out = pl.pallas_call(
        kernel,
        out_shape=jax.ShapeDtypeStruct((b_pad, HEAD_LANE), jnp.float32),
        grid_spec=pltpu.PrefetchScalarGridSpec(
            num_scalar_prefetch=0,
            grid=(b_pad // tb,),
            in_specs=[
                pl.BlockSpec((tb, obs_pad), lambda i: (i, 0)),       # x tile
                pl.BlockSpec((rows_a, la), lambda i: (0, 0)),        # params A (resident)
                pl.BlockSpec((hid_pad, wpad), lambda i: (0, 0)),     # params B (resident)
            ],
            out_specs=pl.BlockSpec((tb, HEAD_LANE), lambda i: (i, 0)),
        ),
        compiler_params=pltpu.CompilerParams(
            dimension_semantics=("parallel",)),
    )(x_pad, pa, pb)

    a = out[:B, :n_words]                    # (B, n_words) log-softmax over words
    c = out[:B, n_words:n_words + 1]         # (B, 1)       critic value
    return a, c


def make_word_matrix(word_list):
    word_array = np.zeros((WORD_WIDTH, len(word_list)), dtype=np.float32)
    for i, word in enumerate(word_list):
        for j, ch in enumerate(word):
            word_array[j * 26 + (ord(ch) - ord("A")), i] = 1.0
    return jnp.asarray(word_array)


def init_params(key, obs_size, hidden_size):
    """Deterministic synthetic init (PyTorch Linear shapes, stored as (in,out))."""
    keys = jax.random.split(key, 10)

    def lin(kw, kb, fan_in, fan_out):
        bound = 1.0 / np.sqrt(fan_in)
        w = jax.random.uniform(kw, (fan_in, fan_out), jnp.float32, -bound, bound)
        b = jax.random.uniform(kb, (1, fan_out), jnp.float32, -bound, bound)
        return w, b

    p = {}
    p["w0"], p["b0"] = lin(keys[0], keys[1], obs_size, hidden_size)
    p["w1"], p["b1"] = lin(keys[2], keys[3], hidden_size, hidden_size)   # n_hidden = 1
    p["w2"], p["b2"] = lin(keys[4], keys[5], hidden_size, WORD_WIDTH)
    p["wa"], p["ba"] = lin(keys[6], keys[7], WORD_WIDTH, WORD_WIDTH)     # actor_head
    p["wc"], p["bc"] = lin(keys[8], keys[9], WORD_WIDTH, 1)              # critic_head
    return p


def reference_forward(x, params, words):
    """Faithful (unfolded, f32) reference of the PyTorch forward."""
    h = jnp.maximum(x @ params["w0"] + params["b0"], 0.0)
    h = jnp.maximum(h @ params["w1"] + params["b1"], 0.0)
    y = jnp.maximum(h @ params["w2"] + params["b2"], 0.0)
    logits = (y @ params["wa"] + params["ba"]) @ words
    a = jax.nn.log_softmax(logits, axis=-1)
    c = y @ params["wc"] + params["bc"]
    return a, c


if __name__ == "__main__":
    word_list = ["APPLE", "BEACH", "CRANE", "DOZEN",
                 "EAGLE", "FLAME", "GRAPE", "HOUSE"]
    B = 8
    obs_size = 32
    hidden_size = 32

    key = jax.random.PRNGKey(0)
    kx, kp = jax.random.split(key)
    x = jax.random.normal(kx, (B, obs_size), dtype=jnp.float32)
    params = init_params(kp, obs_size, hidden_size)
    words = make_word_matrix(word_list)

    # One-time parameter preprocessing (fold + fuse + bias-fold + bf16 pack).
    pa, pb, meta = prepare_params(params, words)

    a, c = sumchars_forward(x, pa, pb, meta)
    a, c = jax.block_until_ready((a, c))

    a_ref, c_ref = reference_forward(x, params, words)
    # bf16 parameters/activations -> relaxed tolerances vs the f32 reference.
    np.testing.assert_allclose(np.asarray(a), np.asarray(a_ref), rtol=3e-2, atol=3e-2)
    np.testing.assert_allclose(np.asarray(c), np.asarray(c_ref), rtol=3e-2, atol=3e-2)

    print("KERNEL_OK")
</pallas_src>

<mosaic_0001>
module attributes {stable_mosaic.version = 11 : i64} {
  func.func @kernel(%arg0: i32, %arg1: memref<8x128xf32, #tpu.memory_space<vmem>>, %arg2: memref<512x128xbf16, #tpu.memory_space<vmem>>, %arg3: memref<128x256xbf16, #tpu.memory_space<vmem>>, %arg4: memref<8x128xf32, #tpu.memory_space<vmem>>) attributes {dimension_semantics = [#tpu.dimension_semantics<parallel>], iteration_bounds = array<i64: 1>, scalar_prefetch = 0 : i64, scratch_operands = 0 : i64, tpu.core_type = #tpu.core_type<tc>, window_params = [{transform_indices = @transform_0, window_bounds = array<i64: 8, 128>}, {pipeline_mode = #tpu.pipeline_mode<synchronous>, transform_indices = @transform_1, window_bounds = array<i64: 512, 128>}, {pipeline_mode = #tpu.pipeline_mode<synchronous>, transform_indices = @transform_2, window_bounds = array<i64: 128, 256>}, {transform_indices = @transform_3, window_bounds = array<i64: 8, 128>}]} {
    %c0 = arith.constant 0 : index
    %c0_0 = arith.constant 0 : index
    %0 = vector.load %arg1[%c0, %c0_0] : memref<8x128xf32, #tpu.memory_space<vmem>>, vector<8x128xf32>
    %1 = arith.truncf %0 : vector<8x128xf32> to vector<8x128xbf16>
    %c0_1 = arith.constant 0 : index
    %c0_2 = arith.constant 0 : index
    %2 = vector.load %arg2[%c0_1, %c0_2] : memref<512x128xbf16, #tpu.memory_space<vmem>>, vector<128x128xbf16>
    %cst = arith.constant dense<0.000000e+00> : vector<8x128xf32>
    %3 = tpu.matmul %1, %2, %cst {dimension_numbers = #tpu.dot_dimension_numbers<[1], [0], [0], [1], [0, 0, 1, 1], [], []>} : vector<8x128xbf16>, vector<128x128xbf16>, vector<8x128xf32> -> vector<8x128xf32>
    %cst_3 = arith.constant 0.000000e+00 : f32
    %4 = vector.broadcast %cst_3 : f32 to vector<8x128xf32>
    %5 = arith.maximumf %3, %4 : vector<8x128xf32>
    %c128 = arith.constant 128 : index
    %c0_4 = arith.constant 0 : index
    %6 = vector.load %arg2[%c128, %c0_4] : memref<512x128xbf16, #tpu.memory_space<vmem>>, vector<128x128xbf16>
    %7 = arith.truncf %5 : vector<8x128xf32> to vector<8x128xbf16>
    %cst_5 = arith.constant dense<0.000000e+00> : vector<8x128xf32>
    %8 = tpu.matmul %7, %6, %cst_5 {dimension_numbers = #tpu.dot_dimension_numbers<[1], [0], [0], [1], [0, 0, 1, 1], [], []>} : vector<8x128xbf16>, vector<128x128xbf16>, vector<8x128xf32> -> vector<8x128xf32>
    %cst_6 = arith.constant 0.000000e+00 : f32
    %9 = vector.broadcast %cst_6 : f32 to vector<8x128xf32>
    %10 = arith.maximumf %8, %9 : vector<8x128xf32>
    %c0_7 = arith.constant 0 : index
    %c0_8 = arith.constant 0 : index
    %11 = vector.load %arg3[%c0_7, %c0_8] : memref<128x256xbf16, #tpu.memory_space<vmem>>, vector<128x256xbf16>
    %12 = arith.truncf %10 : vector<8x128xf32> to vector<8x128xbf16>
    %cst_9 = arith.constant dense<0.000000e+00> : vector<8x256xf32>
    %13 = tpu.matmul %12, %11, %cst_9 {dimension_numbers = #tpu.dot_dimension_numbers<[1], [0], [0], [1], [0, 0, 1, 1], [], []>} : vector<8x128xbf16>, vector<128x256xbf16>, vector<8x256xf32> -> vector<8x256xf32>
    %cst_10 = arith.constant 0.000000e+00 : f32
    %14 = vector.broadcast %cst_10 : f32 to vector<8x256xf32>
    %15 = arith.maximumf %13, %14 : vector<8x256xf32>
    %c256 = arith.constant 256 : index
    %c0_11 = arith.constant 0 : index
    %16 = vector.load %arg2[%c256, %c0_11] : memref<512x128xbf16, #tpu.memory_space<vmem>>, vector<256x128xbf16>
    %17 = arith.truncf %15 : vector<8x256xf32> to vector<8x256xbf16>
    %cst_12 = arith.constant dense<0.000000e+00> : vector<8x128xf32>
    %18 = tpu.matmul %17, %16, %cst_12 {dimension_numbers = #tpu.dot_dimension_numbers<[1], [0], [0], [1], [0, 0, 1, 1], [], []>} : vector<8x256xbf16>, vector<256x128xbf16>, vector<8x128xf32> -> vector<8x128xf32>
    %19 = tpu.iota {dimensions = array<i32: 1>} : vector<8x128xi32>
    %c8_i32 = arith.constant 8 : i32
    %20 = vector.broadcast %c8_i32 : i32 to vector<8x128xi32>
    %21 = arith.cmpi slt, %19, %20 : vector<8x128xi32>
    %cst_13 = arith.constant 0xFF800000 : f32
    %22 = vector.broadcast %cst_13 : f32 to vector<8x128xf32>
    %23 = arith.select %21, %18, %22 : vector<8x128xi1>, vector<8x128xf32>
    %cst_14 = arith.constant dense<0xFF800000> : vector<8xf32>
    %24 = vector.multi_reduction <maximumf>, %23, %cst_14 [1] : vector<8x128xf32> to vector<8xf32>
    %25 = vector.shape_cast %24 : vector<8xf32> to vector<8x1xf32>
    %26 = vector.broadcast %25 : vector<8x1xf32> to vector<8x128xf32>
    %27 = arith.subf %23, %26 : vector<8x128xf32>
    %28 = math.exp %27 : vector<8x128xf32>
    %cst_15 = arith.constant dense<0.000000e+00> : vector<8xf32>
    %29 = vector.multi_reduction <add>, %28, %cst_15 [1] : vector<8x128xf32> to vector<8xf32>
    %30 = vector.shape_cast %29 : vector<8xf32> to vector<8x1xf32>
    %31 = math.log %30 : vector<8x1xf32>
    %32 = arith.addf %25, %31 : vector<8x1xf32>
    %cst_16 = arith.constant 0.000000e+00 : f32
    %33 = vector.shape_cast %32 : vector<8x1xf32> to vector<8x1xf32>
    %34 = vector.broadcast %33 : vector<8x1xf32> to vector<8x128xf32>
    %35 = vector.broadcast %cst_16 : f32 to vector<8x128xf32>
    %36 = arith.select %21, %34, %35 : vector<8x128xi1>, vector<8x128xf32>
    %37 = arith.subf %18, %36 : vector<8x128xf32>
    %c0_17 = arith.constant 0 : index
    %c0_18 = arith.constant 0 : index
    %38 = vector.load %arg4[%c0_17, %c0_18] : memref<8x128xf32, #tpu.memory_space<vmem>>, vector<8x128xf32>
    tpu.vector_store %arg4[%c0_17, %c0_18], %37 {strides = array<i32>} : memref<8x128xf32, #tpu.memory_space<vmem>>, vector<8x128xf32>,
    return
  }
  func.func @transform_0(%arg0: i32) -> (i32, i32) {
    %c0_i32 = arith.constant 0 : i32
    %c0_i32_0 = arith.constant 0 : i32
    return %arg0, %c0_i32 : i32, i32
  }
  func.func @transform_1(%arg0: i32) -> (i32, i32) {
    %c0_i32 = arith.constant 0 : i32
    %c0_i32_0 = arith.constant 0 : i32
    %c0_i32_1 = arith.constant 0 : i32
    return %c0_i32, %c0_i32_0 : i32, i32
  }
  func.func @transform_2(%arg0: i32) -> (i32, i32) {
    %c0_i32 = arith.constant 0 : i32
    %c0_i32_0 = arith.constant 0 : i32
    %c0_i32_1 = arith.constant 0 : i32
    return %c0_i32, %c0_i32_0 : i32, i32
  }
  func.func @transform_3(%arg0: i32) -> (i32, i32) {
    %c0_i32 = arith.constant 0 : i32
    %c0_i32_0 = arith.constant 0 : i32
    return %arg0, %c0_i32 : i32, i32
  }
}

</mosaic_0001>

<bundles_post_ra>
// kernel: tpu_custom_call.1
= control target key start
LH: loop header
LB: loop body
LE: loop exit
PB: predicated region body
PF: predicated region fallthrough
CT: control target
= control target key end

     0   :  { %8 = vsyncpa [#allocation3], 0  ;;  %s941_s0 = inlined_call_operand.hbm [shape: f32[8,128], index: 0, kind: input, shape index: {}]   ;;  %s942_s1 = inlined_call_operand.hbm [shape: bf16[512,128], index: 1, kind: input, shape index: {}]   ;;  %s943_s2 = inlined_call_operand.hbm [shape: bf16[128,256], index: 2, kind: input, shape index: {}]   ;;  %s944_s3 = inlined_call_operand.hbm [shape: f32[8,128], index: 3, kind: output, shape index: {}]  }
   0x1   :  { %9 = vsyncpa [#allocation6], 0 }
   0x2   :  { %10 = vsyncpa [#allocation4], 0  ;;  %s896_s12 = smov [#allocation5]  }
   0x3   :  { %s26_s13 = sshll.u32 %s896_s12, 4  ;;  %s27_s13 = int_to_ptr.vmem [resolvable:$true] %s26_s13 }
   0x4   :  { %s818_s14 = scalar_lea.vmem %s27_s13, 4096  ;;  %p823_p1 = scmp.lt.s32.totalorder %s27_s13, %s27_s13 }
   0x5   :  { %p819_p0 = scmp.ne.s32.totalorder %s27_s13, %s818_s14  ;;  %p824_p2 = scmp.lt.s32.totalorder %s818_s14, %s818_s14 }
   0x7   :  { %p825_p3 = por %p824_p2, %p823_p1 }
   0x9   :  { %p826_p4 = pnand %p825_p3, %p819_p0 }
   0xb   :  { %829 = shalt.err (!%p826_p4)
}
   0xc   :  { %s897_s15 = smov 64   ;;  %s898_s16 = smov 4  }
   0xd   :  { %32 = dma.hbm_to_vmem [thread:$0]  %s942_s1, 4096, %s27_s13, [#allocation6], %s897_s15, %s897_s15, %s898_s16  }
   0xe   :  { %s899_s19 = smov [#allocation2]   ;;  %s900_s21 = smov [#allocation7]  }
   0xf   :  { %s17_s20 = sshll.u32 %s899_s19, 4  ;;  %s38_s22 = sshll.u32 %s900_s21, 4  ;;  %s18_s20 = int_to_ptr.vmem [resolvable:$true] %s17_s20  ;;  %s39_s22 = int_to_ptr.vmem [resolvable:$true] %s38_s22 }
  0x10   :  { %s838_s23 = scalar_lea.vmem %s18_s20, 128  ;;  %p843_p6 = scmp.lt.s32.totalorder %s18_s20, %s18_s20 }
  0x11   :  { %p839_p5 = scmp.ne.s32.totalorder %s18_s20, %s838_s23  ;;  %p844_p7 = scmp.lt.s32.totalorder %s838_s23, %s838_s23 }
  0x13   :  { %p845_p8 = por %p844_p7, %p843_p6 }
  0x15   :  { %p846_p9 = pnand %p845_p8, %p839_p5 }
  0x17   :  { %849 = shalt.err (!%p846_p9)
}
  0x18   :  { %20 = dma.hbm_to_vmem [thread:$0]  %s941_s0, 128, %s18_s20, [#allocation3]  }
  0x19   :  { %s858_s26 = scalar_lea.vmem %s39_s22, 2048  ;;  %p863_p11 = scmp.lt.s32.totalorder %s39_s22, %s39_s22 }
  0x1a   :  { %p859_p10 = scmp.ne.s32.totalorder %s39_s22, %s858_s26  ;;  %p864_p12 = scmp.lt.s32.totalorder %s858_s26, %s858_s26 }
  0x1c   :  { %p865_p13 = por %p864_p12, %p863_p11 }
  0x1e   :  { %p866_p0 = pnand %p865_p13, %p859_p10 }
  0x20   :  { %869 = shalt.err (!%p866_p0)
}
  0x21   :  { %s901_s1 = smov 128   ;;  %s902_s27 = smov 8  }
  0x22   :  { %44 = dma.hbm_to_vmem [thread:$0]  %s943_s2, 2048, %s39_s22, [#allocation6], %s901_s1, %s901_s1, %s902_s27  }
  0x23   :  { %890 = dma.done.wait [#allocation3], 128  }
  0x24   :  { %891 = vsyncadd [#allocation3], 4294967168 }
  0x25   :  { %892 = dma.done.wait [#allocation6], 6144  }
  0x26   :  { %893 = vsyncadd [#allocation6], 4294961152  ;;  %v903_v0 = vmov 0.0   ;;  %vm904_vm0 = vmmov 0   ;;  %v750_v1 = vld [vmem:[#allocation5 + $0x38] sm:$0xff]   ;;  %v751_v2 = vld [vmem:[#allocation5 + $0x30] sm:$0xff]  }
  0x27   :  { %699 = vmatprep.subr.bf16.mxu0 %v903_v0  ;;  %715 = vmatprep.mubr.msk.bf16.mxu0 %vm904_vm0, %v903_v0  ;;  %v752_v3 = vld [vmem:[#allocation5 + $0x28] sm:$0xff]   ;;  %v758_v4 = vld [vmem:[#allocation5 + $0x78] sm:$0xff]   ;;  %v753_v5 = vld [vmem:[#allocation5 + $0x20] sm:$0xff]   ;;  %v905_v41 = vmov 0   ;;  %s906_s0 = smov [#allocation8]  }
  0x28   :  { %719 = vmatprep.subr.bf16.mxu1 %v903_v0  ;;  %735 = vmatprep.mubr.msk.bf16.mxu1 %vm904_vm0, %v903_v0  ;;  %v759_v6 = vld [vmem:[#allocation5 + $0x70] sm:$0xff]   ;;  %v754_v7 = vld [vmem:[#allocation5 + $0x18] sm:$0xff]   ;;  %v760_v8 = vld [vmem:[#allocation5 + $0x68] sm:$0xff]   ;;  %s601_s2 = sshll.u32 %s906_s0, 4  ;;  %s602_s2 = int_to_ptr.vmem [resolvable:$true] %s601_s2 }
  0x29   :  { %700 = vmatpush3.bf16.msra.mxu0 %v750_v1  ;;  %720 = vmatpush3.bf16.msra.mxu1 %v758_v4  ;;  %v755_v9 = vld [vmem:[#allocation5 + $0x10] sm:$0xff]   ;;  %v761_v10 = vld [vmem:[#allocation5 + $0x60] sm:$0xff]   ;;  %v756_v11 = vld [vmem:[#allocation5 + $0x8] sm:$0xff]   ;;  %s870_s30 = scalar_lea.vmem %s602_s2, 128  ;;  %p875_p2 = scmp.lt.s32.totalorder %s602_s2, %s602_s2 }
  0x2a   :  { %701 = vmatprep.subr.bf16.mxu0 %v903_v0  ;;  %721 = vmatprep.subr.bf16.mxu1 %v903_v0  ;;  %v762_v12 = vld [vmem:[#allocation5 + $0x58] sm:$0xff]   ;;  %v757_v13 = vld [vmem:[#allocation5] sm:$0xff]   ;;  %v763_v15 = vld [vmem:[#allocation5 + $0x50] sm:$0xff]   ;;  %p871_p1 = scmp.ne.s32.totalorder %s602_s2, %s870_s30  ;;  %p876_p3 = scmp.lt.s32.totalorder %s870_s30, %s870_s30 }
  0x2b   :  { %v55_v14 = vld [vmem:[#allocation2] sm:$0xff]  ;;  %v764_v17 = vld [vmem:[#allocation5 + $0x48] sm:$0xff]   ;;  %v765_v18 = vld [vmem:[#allocation5 + $0x40] sm:$0xff]  }
  0x2c   :  { %v56_v16 = vpack.c.bf16 %v55_v14, %v55_v14  ;;  %v766_v19 = vld [vmem:[#allocation7 + $0x70] ss:$8 sps:$4 sm:$0xff]   ;;  %v768_v20 = vld [vmem:[#allocation7 + $0x74] ss:$8 sps:$4 sm:$0xff]   ;;  %v771_v21 = vld [vmem:[#allocation7 + $0x64] ss:$8 sps:$4 sm:$0xff]   ;;  %p877_p4 = por %p876_p3, %p875_p2 }
  0x2d   :  { %702 = vmatpush3.bf16.msra.mxu0 %v751_v2  ;;  %722 = vmatpush3.bf16.msra.mxu1 %v759_v6  ;;  %v769_v22 = vld [vmem:[#allocation7 + $0x60] ss:$8 sps:$4 sm:$0xff]   ;;  %v774_v23 = vld [vmem:[#allocation7 + $0x54] ss:$8 sps:$4 sm:$0xff]   ;;  %v772_v24 = vld [vmem:[#allocation7 + $0x50] ss:$8 sps:$4 sm:$0xff]  }
  0x2e   :  { %703 = vmatprep.subr.bf16.mxu0 %v903_v0  ;;  %723 = vmatprep.subr.bf16.mxu1 %v903_v0  ;;  %v777_v25 = vld [vmem:[#allocation7 + $0x44] ss:$8 sps:$4 sm:$0xff]   ;;  %v775_v26 = vld [vmem:[#allocation7 + $0x40] ss:$8 sps:$4 sm:$0xff]   ;;  %v780_v27 = vld [vmem:[#allocation7 + $0x34] ss:$8 sps:$4 sm:$0xff]   ;;  %p878_p5 = pnand %p877_p4, %p871_p1 }
  0x2f   :  { %v778_v28 = vld [vmem:[#allocation7 + $0x30] ss:$8 sps:$4 sm:$0xff]   ;;  %v783_v29 = vld [vmem:[#allocation7 + $0x24] ss:$8 sps:$4 sm:$0xff]   ;;  %v781_v30 = vld [vmem:[#allocation7 + $0x20] ss:$8 sps:$4 sm:$0xff]  }
  0x30   :  { %v786_v31 = vld [vmem:[#allocation7 + $0x14] ss:$8 sps:$4 sm:$0xff]   ;;  %v784_v32 = vld [vmem:[#allocation7 + $0x10] ss:$8 sps:$4 sm:$0xff]   ;;  %v789_v39 = vld [vmem:[#allocation7 + $0x4] ss:$8 sps:$4 sm:$0xff]  }
  0x31   :  { %704 = vmatpush3.bf16.msra.mxu0 %v752_v3  ;;  %724 = vmatpush3.bf16.msra.mxu1 %v760_v8  ;;  %v787_v40 = vld [vmem:[#allocation7] ss:$8 sps:$4 sm:$0xff]   ;;  %v790_v42 = vld [vmem:[#allocation5 + $0xf8] sm:$0xff]   ;;  %v792_v44 = vld [vmem:[#allocation5 + $0xf0] sm:$0xff]   ;;  %v578_v8 = vlaneseq }
  0x32   :  { %705 = vmatprep.subr.bf16.mxu0 %v903_v0  ;;  %725 = vmatprep.subr.bf16.mxu1 %v903_v0  ;;  %v791_v43 = vld [vmem:[#allocation5 + $0xb8] sm:$0xff]   ;;  %v793_v45 = vld [vmem:[#allocation5 + $0xb0] sm:$0xff]   ;;  %v794_v46 = vld [vmem:[#allocation5 + $0xe8] sm:$0xff]  }
  0x33   :  { %v795_v47 = vld [vmem:[#allocation5 + $0xa8] sm:$0xff]   ;;  %v796_v48 = vld [vmem:[#allocation5 + $0xe0] sm:$0xff]   ;;  %v798_v50 = vld [vmem:[#allocation5 + $0xd8] sm:$0xff]  }
  0x34   :  { %v797_v49 = vld [vmem:[#allocation5 + $0xa0] sm:$0xff]   ;;  %v799_v51 = vld [vmem:[#allocation5 + $0x98] sm:$0xff]   ;;  %v800_v52 = vld [vmem:[#allocation5 + $0xd0] sm:$0xff]  }
  0x35   :  { %706 = vmatpush3.bf16.msra.mxu0 %v753_v5  ;;  %726 = vmatpush3.bf16.msra.mxu1 %v761_v10  ;;  %v801_v53 = vld [vmem:[#allocation5 + $0x90] sm:$0xff]   ;;  %v802_v60 = vld [vmem:[#allocation5 + $0xc8] sm:$0xff]   ;;  %v804_v62 = vld [vmem:[#allocation5 + $0xc0] sm:$0xff]  }
  0x36   :  { %707 = vmatprep.subr.bf16.mxu0 %v903_v0  ;;  %727 = vmatprep.subr.bf16.mxu1 %v903_v0  ;;  %v803_v61 = vld [vmem:[#allocation5 + $0x88] sm:$0xff]   ;;  %v805_v63 = vld [vmem:[#allocation5 + $0x80] sm:$0xff]  }
  0x39   :  { %708 = vmatpush3.bf16.msra.mxu0 %v754_v7  ;;  %728 = vmatpush3.bf16.msra.mxu1 %v762_v12 }
  0x3a   :  { %709 = vmatprep.subr.bf16.mxu0 %v903_v0  ;;  %729 = vmatprep.subr.bf16.mxu1 %v903_v0 }
  0x3d   :  { %710 = vmatpush3.bf16.msra.mxu0 %v755_v9  ;;  %730 = vmatpush3.bf16.msra.mxu1 %v763_v15  ;;  %v579_v9 = vand.u32 127, %v578_v8 }
  0x3e   :  { %711 = vmatprep.subr.bf16.mxu0 %v903_v0  ;;  %731 = vmatprep.subr.bf16.mxu1 %v903_v0 }
  0x3f   :  { %vm580_vm1 = vcmp.lt.s32.totalorder %v579_v9, 8 }
  0x41   :  { %712 = vmatpush3.bf16.msra.mxu0 %v756_v11  ;;  %732 = vmatpush3.bf16.msra.mxu1 %v764_v17 }
  0x42   :  { %713 = vmatprep.subr.bf16.mxu0 %v903_v0  ;;  %733 = vmatprep.subr.bf16.mxu1 %v903_v0 }
  0x45   :  { %714 = vmatpush3.bf16.msra.mxu0 %v757_v13  ;;  %734 = vmatpush3.bf16.msra.mxu1 %v765_v18 }
  0x46   :  { %365 = vmatprep.subr.bf16.mxu0 %v768_v20  ;;  %677 = vmatprep.subr.bf16.mxu1 %v790_v42 }
  0x48   :  { %716 = vmatmul.mubr.bf16.vlgmr.msra.gmra.mxu0 %v56_v16 }
  0x49   :  { %366 = vmatpush1.bf16.msra.mxu0 %v766_v19  ;;  %397 = vmatprep.mubr.bf16.mxu0 %v905_v41 }
  0x4a   :  { %367 = vmatprep.subr.bf16.mxu0 %v771_v21 }
  0x4d   :  { %368 = vmatpush1.bf16.msra.mxu0 %v769_v22 }
  0x4e   :  { %369 = vmatprep.subr.bf16.mxu0 %v774_v23 }
  0x51   :  { %370 = vmatpush1.bf16.msra.mxu0 %v772_v24 }
  0x52   :  { %371 = vmatprep.subr.bf16.mxu0 %v777_v25 }
  0x55   :  { %372 = vmatpush1.bf16.msra.mxu0 %v775_v26 }
  0x56   :  { %373 = vmatprep.subr.bf16.mxu0 %v780_v27 }
  0x59   :  { %374 = vmatpush1.bf16.msra.mxu0 %v778_v28 }
  0x5a   :  { %375 = vmatprep.subr.bf16.mxu0 %v783_v29 }
  0x5d   :  { %376 = vmatpush1.bf16.msra.mxu0 %v781_v30 }
  0x5e   :  { %377 = vmatprep.subr.bf16.mxu0 %v786_v31 }
  0x61   :  { %378 = vmatpush1.bf16.msra.mxu0 %v784_v32 }
  0x62   :  { %379 = vmatprep.subr.bf16.mxu0 %v789_v39 }
  0x65   :  { %380 = vmatpush1.bf16.msra.mxu0 %v787_v40 }
 0x108   :  { %v155_v33 = vpop.f32.mrf.mxu0 }
 0x109   :  { %v161_v34 = vmax.f32 %v155_v33, 0.0 }
 0x10a   :  { %v717_v35 = vpop.f32.mrf.mxu0 }
 0x10b   :  { %v178_v36 = vpack.c.bf16 %v161_v34, %v161_v34 }
 0x10c   :  { %v158_v37 = vpop.f32.mrf.mxu0 }
 0x10d   :  { %736 = vmatmul.mubr.bf16.vlgmr.msra.gmra.mxu1 %v178_v36 }
 0x10e   :  { %v718_v38 = vpop.f32.mrf.mxu0  ;;  %678 = vmatpush3.bf16.msra.mxu1 %v791_v43 }
 0x10f   :  { %679 = vmatprep.subr.bf16.mxu1 %v792_v44 }
 0x112   :  { %680 = vmatpush3.bf16.msra.mxu1 %v793_v45 }
 0x113   :  { %681 = vmatprep.subr.bf16.mxu1 %v794_v46 }
 0x116   :  { %682 = vmatpush3.bf16.msra.mxu1 %v795_v47 }
 0x117   :  { %683 = vmatprep.subr.bf16.mxu1 %v796_v48 }
 0x11a   :  { %684 = vmatpush3.bf16.msra.mxu1 %v797_v49 }
 0x11b   :  { %685 = vmatprep.subr.bf16.mxu1 %v798_v50 }
 0x11e   :  { %686 = vmatpush3.bf16.msra.mxu1 %v799_v51 }
 0x11f   :  { %687 = vmatprep.subr.bf16.mxu1 %v800_v52 }
 0x122   :  { %688 = vmatpush3.bf16.msra.mxu1 %v801_v53 }
 0x123   :  { %689 = vmatprep.subr.bf16.mxu1 %v802_v60 }
 0x126   :  { %690 = vmatpush3.bf16.msra.mxu1 %v803_v61 }
 0x127   :  { %691 = vmatprep.subr.bf16.mxu1 %v804_v62 }
 0x12a   :  { %692 = vmatpush3.bf16.msra.mxu1 %v805_v63 }
 0x1cd   :  { %v261_v54 = vpop.f32.mrf.mxu1 }
 0x1ce   :  { %v267_v55 = vmax.f32 %v261_v54, 0.0 }
 0x1cf   :  { %v737_v56 = vpop.f32.mrf.mxu1 }
 0x1d0   :  { %v284_v57 = vpack.c.bf16 %v267_v55, %v267_v55 }
 0x1d1   :  { %v264_v58 = vpop.f32.mrf.mxu1 }
 0x1d2   :  { %398 = vmatmul.mubr.bf16.vlgmr.msra.gmra.mxu0 %v284_v57 }
 0x1d3   :  { %v738_v59 = vpop.f32.mrf.mxu1 }
 0x292   :  { %v399_v0 = vpop.f32.mrf.mxu0 }
 0x293   :  { %v406_v1 = vmax.f32 %v399_v0, 0.0 }
 0x294   :  { %v401_v2 = vpop.f32.mrf.mxu0 }
 0x295   :  { %v407_v3 = vmax.f32 %v401_v2, 0.0  ;;  %v440_v6 = vpack.c.bf16 %v406_v1, %v406_v1 }
 0x296   :  { %v403_v4 = vpop.f32.mrf.mxu0 }
 0x297   :  { %v441_v5 = vpack.c.bf16 %v407_v3, %v407_v3 }
 0x298   :  { %v404_v7 = vpop.f32.mrf.mxu0 }
 0x299   :  { %570 = vmatprep.mubr.bf16.mxu1 %v441_v5 }
 0x29a   :  { %571 = vmatmul.mubr.bf16.vlgmr.msra.gmra.mxu1 %v440_v6 }
 0x35a   :  { %v693_v10 = vpop.f32.mrf.mxu1 }
 0x35c   :  { %v694_v11 = vpop.f32.mrf.mxu1 }
 0x35d   :  { %v695_v12 = vadd.f32 %v694_v11, %v693_v10 }
 0x35e   :  { %v696_v13 = vpop.f32.mrf.mxu1 }
 0x35f   :  { %v581_v14 = vsel %vm580_vm1, %v695_v12, -inf }
 0x360   :  { %v697_v15 = vpop.f32.mrf.mxu1  ;;  %582 = vmax.xlane.f32.xlu0 %v581_v14 }
 0x3e9   :  { %v583_v16 = vpop.xlane.xlu0 %582 }
 0x3ea   :  { %v584_v17 = vsub.f32 %v581_v14, %v583_v16 }
 0x3ec   :  { %v585_v18 = vmul.f32 1.442695, %v584_v17 }
 0x3ee   :  { %806 = vpow2.f32 %v585_v18 }
 0x3fb   :  { %v807_v19 = vpop.eup %806 }
 0x3fc   :  { %587 = vadd.xlane.f32.xlu0 %v807_v19 }
 0x485   :  { %v588_v20 = vpop.xlane.xlu0 %587 }
 0x486   :  { %808 = vlog2.f32 %v588_v20 }
 0x493   :  { %v809_v21 = vpop.eup %808 }
 0x494   :  { %v590_v22 = vmul.f32 0.6931472, %v809_v21 }
 0x496   :  { %v591_v23 = vadd.f32 %v590_v22, %v583_v16 }
 0x498   :  { %v592_v24 = vsel %vm580_vm1, %v591_v23, 0.0 }
 0x499   :  { %v593_v25 = vsub.f32 %v695_v12, %v592_v24 }
 0x49b   :  { %594 = vst [vmem:[#allocation8] sm:$0xff] %v593_v25 }
 0x49c   :  { %881 = shalt.err (!%p878_p5)
}
 0x49d   :  { %604 = dma.vmem_to_hbm [thread:$0]  %s602_s2, 128, %s944_s3, [#allocation4]  }
 0x49e   :  { %894 = dma.done.wait [#allocation4], 128  }
 0x49f   :  { %895 = vsyncadd [#allocation4], 4294967168 }
 0x4a0   :  { %608 = vsyncpa [#allocation3], 1 }
 0x4a1   :  { %609 = vsyncpa [#allocation6], 1 }
 0x4a2   :  { %610 = vsyncpa [#allocation4], 1 }

</bundles_post_ra>
